<compile_context>
chip_gen: v6e
topology: v6e:2x2x1
jax: 0.10.0
libtpu: 0.0.40
codegen_flags: <defaults>
</compile_context>

<pallas_src>
from functools import partial

import jax
import jax.numpy as jnp
from jax import lax
from jax.experimental import pallas as pl
from jax.experimental.pallas import tpu as pltpu


def _rcb_kernel(x_ref, w_ref, b_ref, *rest, K, pad, TL, has_proj):
    """One (batch element, length tile) per grid step.

    x_ref : (Cin, TL + 2*pad)   halo'd input tile (compute dtype)
    w_ref : (Cout, K*Cin)       flattened conv weight (im2col order: k-major, cin-minor)
    b_ref : (Cout, 1)           conv bias (f32)
    [ws_ref: (Cout, Cin), bs_ref: (Cout, 1)]  only when Cin != Cout (projection shortcut)
    out_ref: (Cout, TL)
    """
    if has_proj:
        ws_ref, bs_ref, out_ref = rest
    else:
        (out_ref,) = rest

    x = x_ref[...]                                    # (Cin, TL + 2*pad)

    # im2col: stack the K shifted views along the channel (sublane) axis so the whole
    # K-tap conv is a single MXU matmul with contraction dim K*Cin.
    if K > 1:
        cols = jnp.concatenate([x[:, k:k + TL] for k in range(K)], axis=0)  # (K*Cin, TL)
    else:
        cols = x

    conv = jnp.dot(w_ref[...], cols, preferred_element_type=jnp.float32)   # (Cout, TL) f32
    conv = conv + b_ref[...]                          # bias broadcast over length
    out = jnp.maximum(conv, 0.0)                      # ReLU
    # Dropout: identity (eval mode).

    # Shortcut over the un-haloed center window + residual add.
    center = x[:, pad:pad + TL]                       # (Cin, TL)
    if has_proj:
        res = jnp.dot(ws_ref[...], center, preferred_element_type=jnp.float32) + bs_ref[...]
    else:
        res = center.astype(jnp.float32)              # identity shortcut: direct add

    out_ref[...] = (out + res).astype(out_ref.dtype)


def residual_conv_block(x, w, b, ws=None, bs=None, *,
                        block_l=512,
                        compute_dtype=None,
                        vmem_limit_bytes=32 * 1024 * 1024):
    """Forward pass of ResidualConvBlock.

    x : (B, Cin, L)          activations
    w : (Cout, Cin, K)       PyTorch Conv1d weight layout
    b : (Cout,)              conv bias
    ws: (Cout, Cin, 1) or None   1x1 shortcut conv weight (None -> identity shortcut)
    bs: (Cout,) or None          shortcut bias
    block_l: target length-tile (multiple of 128 recommended; ~512 on v7x,
             can be raised to 1024-2048 on v5e/v6e's 128 MiB VMEM).
    compute_dtype: dtype for MXU operands (e.g. jnp.bfloat16); accumulation stays f32.
    """
    B, Cin, L = x.shape
    Cout, Cin_w, K = w.shape
    assert Cin_w == Cin, (Cin_w, Cin)
    assert K % 2 == 1, "PyTorch-style 'same' residual block requires odd kernel_size"
    pad = (K - 1) // 2

    has_proj = ws is not None
    if not has_proj:
        assert Cin == Cout, "identity shortcut requires Cin == Cout"

    cdt = compute_dtype if compute_dtype is not None else x.dtype
    out_dtype = x.dtype

    # Length tiling: lane-dense tiles when L is large, full L otherwise.
    TL = block_l if L >= block_l else L
    nL = pl.cdiv(L, TL)
    L_pad = nL * TL
    TLh = TL + 2 * pad

    # Build per-tile halo'd windows: (B, nL, Cin, TL + 2*pad).
    x_p = jnp.pad(x, ((0, 0), (0, 0), (pad, pad + (L_pad - L)))).astype(cdt)
    win_idx = jnp.arange(nL)[:, None] * TL + jnp.arange(TLh)[None, :]       # (nL, TLh)
    x_tiles = jnp.transpose(x_p[:, :, win_idx], (0, 2, 1, 3))               # (B, nL, Cin, TLh)

    # Flatten conv weights to im2col order: w_flat[o, k*Cin + c] = w[o, c, k].
    w_flat = jnp.transpose(w, (0, 2, 1)).reshape(Cout, K * Cin).astype(cdt)
    b2 = b.reshape(Cout, 1).astype(jnp.float32)

    in_arrays = [x_tiles, w_flat, b2]
    in_specs = [
        pl.BlockSpec((None, None, Cin, TLh), lambda bi, li: (bi, li, 0, 0)),  # per-(batch, tile)
        pl.BlockSpec((Cout, K * Cin), lambda bi, li: (0, 0)),                 # resident weights
        pl.BlockSpec((Cout, 1), lambda bi, li: (0, 0)),
    ]
    if has_proj:
        ws2 = ws.reshape(Cout, Cin).astype(cdt)
        bs2 = bs.reshape(Cout, 1).astype(jnp.float32)
        in_arrays += [ws2, bs2]
        in_specs += [
            pl.BlockSpec((Cout, Cin), lambda bi, li: (0, 0)),
            pl.BlockSpec((Cout, 1), lambda bi, li: (0, 0)),
        ]

    kernel = partial(_rcb_kernel, K=K, pad=pad, TL=TL, has_proj=has_proj)

    out = pl.pallas_call(
        kernel,
        out_shape=jax.ShapeDtypeStruct((B, Cout, L_pad), out_dtype),
        grid=(B, nL),
        in_specs=in_specs,
        out_specs=pl.BlockSpec((None, Cout, TL), lambda bi, li: (bi, 0, li)),
        compiler_params=pltpu.CompilerParams(
            dimension_semantics=("parallel", "parallel"),
            vmem_limit_bytes=vmem_limit_bytes,
        ),
    )(*in_arrays)

    return out[:, :, :L] if L_pad != L else out


def reference(x, w, b, ws=None, bs=None):
    """Pure-JAX reference (dropout = identity). Weights in PyTorch layout."""
    Cout, Cin, K = w.shape
    pad = (K - 1) // 2
    conv = lax.conv_general_dilated(
        x, w, window_strides=(1,), padding=[(pad, pad)],
        dimension_numbers=('NCH', 'OIH', 'NCH')) + b[None, :, None]
    out = jnp.maximum(conv, 0.0)
    if ws is None:
        res = x
    else:
        res = jnp.einsum('ock,bcl->bol', ws, x) + bs[None, :, None]
    return out + res


def _check(name, got, want, atol, rtol):
    err = float(jnp.abs(got - want).max())
    assert got.shape == want.shape, (name, got.shape, want.shape)
    assert jnp.allclose(got, want, atol=atol, rtol=rtol), (name, err)


if __name__ == "__main__":
    key = jax.random.PRNGKey(0)
    kx, kw, kb, kws, kbs, kx2, kw2, kb2, kx3, kw3, kb3, kws3, kbs3 = jax.random.split(key, 13)

    # --- Case 1: projection shortcut (Cin != Cout), tiny shapes --------------------
    B, Cin, Cout, L, K = 2, 4, 8, 16, 3
    x = jax.random.normal(kx, (B, Cin, L), dtype=jnp.float32)
    w = 0.1 * jax.random.normal(kw, (Cout, Cin, K), dtype=jnp.float32)
    b = 0.1 * jax.random.normal(kb, (Cout,), dtype=jnp.float32)
    ws = 0.1 * jax.random.normal(kws, (Cout, Cin, 1), dtype=jnp.float32)
    bs = 0.1 * jax.random.normal(kbs, (Cout,), dtype=jnp.float32)

    out1 = jax.block_until_ready(residual_conv_block(x, w, b, ws, bs))
    _check("proj_f32", out1, reference(x, w, b, ws, bs), atol=1e-5, rtol=1e-5)

    # --- Case 2: identity shortcut (Cin == Cout) -----------------------------------
    C = 8
    x2 = jax.random.normal(kx2, (B, C, L), dtype=jnp.float32)
    w2 = 0.1 * jax.random.normal(kw2, (C, C, K), dtype=jnp.float32)
    b2 = 0.1 * jax.random.normal(kb2, (C,), dtype=jnp.float32)

    out2 = jax.block_until_ready(residual_conv_block(x2, w2, b2))
    _check("identity_f32", out2, reference(x2, w2, b2), atol=1e-5, rtol=1e-5)

    # --- Case 3: multiple lane-dense L tiles (L=256, TL=128), K=5 ------------------
    L3, K3 = 256, 5
    x3 = jax.random.normal(kx3, (B, Cin, L3), dtype=jnp.float32)
    w3 = 0.1 * jax.random.normal(kw3, (Cout, Cin, K3), dtype=jnp.float32)
    b3 = 0.1 * jax.random.normal(kb3, (Cout,), dtype=jnp.float32)
    ws3 = 0.1 * jax.random.normal(kws3, (Cout, Cin, 1), dtype=jnp.float32)
    bs3 = 0.1 * jax.random.normal(kbs3, (Cout,), dtype=jnp.float32)

    out3 = jax.block_until_ready(residual_conv_block(x3, w3, b3, ws3, bs3, block_l=128))
    _check("tiled_f32", out3, reference(x3, w3, b3, ws3, bs3), atol=1e-5, rtol=1e-5)

    # --- Case 4: bf16 MXU operands, f32 accumulation --------------------------------
    out4 = jax.block_until_ready(
        residual_conv_block(x, w, b, ws, bs, compute_dtype=jnp.bfloat16))
    _check("proj_bf16", out4, reference(x, w, b, ws, bs), atol=5e-2, rtol=5e-2)

    print("KERNEL_OK")
</pallas_src>

<mosaic_0001>
module attributes {stable_mosaic.version = 11 : i64} {
  func.func @_rcb_kernel(%arg0: i32, %arg1: i32, %arg2: memref<1x1x4x18xf32, #tpu.memory_space<vmem>>, %arg3: memref<8x12xf32, #tpu.memory_space<vmem>>, %arg4: memref<8x1xf32, #tpu.memory_space<vmem>>, %arg5: memref<8x4xf32, #tpu.memory_space<vmem>>, %arg6: memref<8x1xf32, #tpu.memory_space<vmem>>, %arg7: memref<1x8x16xf32, #tpu.memory_space<vmem>>) attributes {dimension_semantics = [#tpu.dimension_semantics<parallel>, #tpu.dimension_semantics<parallel>], iteration_bounds = array<i64: 2, 1>, scalar_prefetch = 0 : i64, scratch_operands = 0 : i64, tpu.core_type = #tpu.core_type<tc>, window_params = [{transform_indices = @transform_0, window_bounds = array<i64: 1, 1, 4, 18>}, {pipeline_mode = #tpu.pipeline_mode<synchronous>, transform_indices = @transform_1, window_bounds = array<i64: 8, 12>}, {pipeline_mode = #tpu.pipeline_mode<synchronous>, transform_indices = @transform_2, window_bounds = array<i64: 8, 1>}, {pipeline_mode = #tpu.pipeline_mode<synchronous>, transform_indices = @transform_3, window_bounds = array<i64: 8, 4>}, {pipeline_mode = #tpu.pipeline_mode<synchronous>, transform_indices = @transform_4, window_bounds = array<i64: 8, 1>}, {transform_indices = @transform_5, window_bounds = array<i64: 1, 8, 16>}]} {
    %c0 = arith.constant 0 : index
    %c0_0 = arith.constant 0 : index
    %c0_1 = arith.constant 0 : index
    %c0_2 = arith.constant 0 : index
    %0 = vector.load %arg2[%c0, %c0_0, %c0_1, %c0_2] : memref<1x1x4x18xf32, #tpu.memory_space<vmem>>, vector<1x1x4x18xf32>
    %1 = vector.shape_cast %0 : vector<1x1x4x18xf32> to vector<4x18xf32>
    %2 = vector.extract_strided_slice %1 {offsets = [0, 0], sizes = [4, 16], strides = [1, 1]} : vector<4x18xf32> to vector<4x16xf32>
    %3 = vector.extract_strided_slice %1 {offsets = [0, 1], sizes = [4, 16], strides = [1, 1]} : vector<4x18xf32> to vector<4x16xf32>
    %4 = vector.extract_strided_slice %1 {offsets = [0, 2], sizes = [4, 16], strides = [1, 1]} : vector<4x18xf32> to vector<4x16xf32>
    %5 = tpu.concatenate %2, %3, %4 in 0 : vector<4x16xf32>, vector<4x16xf32>, vector<4x16xf32> -> vector<12x16xf32>
    %c0_3 = arith.constant 0 : index
    %c0_4 = arith.constant 0 : index
    %6 = vector.load %arg3[%c0_3, %c0_4] : memref<8x12xf32, #tpu.memory_space<vmem>>, vector<8x12xf32>
    %cst = arith.constant dense<0.000000e+00> : vector<8x16xf32>
    %7 = tpu.matmul %6, %5, %cst {dimension_numbers = #tpu.dot_dimension_numbers<[1], [0], [0], [1], [0, 0, 1, 1], [], []>} : vector<8x12xf32>, vector<12x16xf32>, vector<8x16xf32> -> vector<8x16xf32>
    %c0_5 = arith.constant 0 : index
    %c0_6 = arith.constant 0 : index
    %8 = vector.load %arg4[%c0_5, %c0_6] : memref<8x1xf32, #tpu.memory_space<vmem>>, vector<8x1xf32>
    %9 = vector.broadcast %8 : vector<8x1xf32> to vector<8x16xf32>
    %10 = arith.addf %7, %9 : vector<8x16xf32>
    %cst_7 = arith.constant 0.000000e+00 : f32
    %11 = vector.broadcast %cst_7 : f32 to vector<8x16xf32>
    %12 = arith.maximumf %10, %11 : vector<8x16xf32>
    %13 = vector.extract_strided_slice %1 {offsets = [0, 1], sizes = [4, 16], strides = [1, 1]} : vector<4x18xf32> to vector<4x16xf32>
    %c0_8 = arith.constant 0 : index
    %c0_9 = arith.constant 0 : index
    %14 = vector.load %arg5[%c0_8, %c0_9] : memref<8x4xf32, #tpu.memory_space<vmem>>, vector<8x4xf32>
    %cst_10 = arith.constant dense<0.000000e+00> : vector<8x16xf32>
    %15 = tpu.matmul %14, %13, %cst_10 {dimension_numbers = #tpu.dot_dimension_numbers<[1], [0], [0], [1], [0, 0, 1, 1], [], []>} : vector<8x4xf32>, vector<4x16xf32>, vector<8x16xf32> -> vector<8x16xf32>
    %c0_11 = arith.constant 0 : index
    %c0_12 = arith.constant 0 : index
    %16 = vector.load %arg6[%c0_11, %c0_12] : memref<8x1xf32, #tpu.memory_space<vmem>>, vector<8x1xf32>
    %17 = vector.broadcast %16 : vector<8x1xf32> to vector<8x16xf32>
    %18 = arith.addf %15, %17 : vector<8x16xf32>
    %19 = arith.addf %12, %18 : vector<8x16xf32>
    %c0_13 = arith.constant 0 : index
    %c0_14 = arith.constant 0 : index
    %c0_15 = arith.constant 0 : index
    %20 = vector.load %arg7[%c0_13, %c0_14, %c0_15] : memref<1x8x16xf32, #tpu.memory_space<vmem>>, vector<1x8x16xf32>
    %21 = vector.shape_cast %20 : vector<1x8x16xf32> to vector<8x16xf32>
    %22 = vector.shape_cast %19 : vector<8x16xf32> to vector<1x8x16xf32>
    tpu.vector_store %arg7[%c0_13, %c0_14, %c0_15], %22 {strides = array<i32>} : memref<1x8x16xf32, #tpu.memory_space<vmem>>, vector<1x8x16xf32>,
    return
  }
  func.func @transform_0(%arg0: i32, %arg1: i32) -> (i32, i32, i32, i32) {
    %c0_i32 = arith.constant 0 : i32
    %c0_i32_0 = arith.constant 0 : i32
    %c0_i32_1 = arith.constant 0 : i32
    return %arg0, %arg1, %c0_i32, %c0_i32_0 : i32, i32, i32, i32
  }
  func.func @transform_1(%arg0: i32, %arg1: i32) -> (i32, i32) {
    %c0_i32 = arith.constant 0 : i32
    %c0_i32_0 = arith.constant 0 : i32
    %c0_i32_1 = arith.constant 0 : i32
    return %c0_i32, %c0_i32_0 : i32, i32
  }
  func.func @transform_2(%arg0: i32, %arg1: i32) -> (i32, i32) {
    %c0_i32 = arith.constant 0 : i32
    %c0_i32_0 = arith.constant 0 : i32
    %c0_i32_1 = arith.constant 0 : i32
    return %c0_i32, %c0_i32_0 : i32, i32
  }
  func.func @transform_3(%arg0: i32, %arg1: i32) -> (i32, i32) {
    %c0_i32 = arith.constant 0 : i32
    %c0_i32_0 = arith.constant 0 : i32
    %c0_i32_1 = arith.constant 0 : i32
    return %c0_i32, %c0_i32_0 : i32, i32
  }
  func.func @transform_4(%arg0: i32, %arg1: i32) -> (i32, i32) {
    %c0_i32 = arith.constant 0 : i32
    %c0_i32_0 = arith.constant 0 : i32
    %c0_i32_1 = arith.constant 0 : i32
    return %c0_i32, %c0_i32_0 : i32, i32
  }
  func.func @transform_5(%arg0: i32, %arg1: i32) -> (i32, i32, i32) {
    %c0_i32 = arith.constant 0 : i32
    %c0_i32_0 = arith.constant 0 : i32
    return %arg0, %c0_i32, %arg1 : i32, i32, i32
  }
}

</mosaic_0001>

<bundles_post_ra>
// kernel: tpu_custom_call.1
= control target key start
LH: loop header
LB: loop body
LE: loop exit
PB: predicated region body
PF: predicated region fallthrough
CT: control target
= control target key end

     0   :  { %10 = vsyncpa [#allocation3], 0  ;;  %s832_s0 = inlined_call_operand.vmem [shape: f32[2,1,4,18], index: 0, kind: input, shape index: {}]   ;;  %s833_s1 = inlined_call_operand.vmem [shape: f32[8,12], index: 1, kind: input, shape index: {}]   ;;  %s834_s2 = inlined_call_operand.vmem [shape: f32[8,1], index: 2, kind: input, shape index: {}]   ;;  %s835_s3 = inlined_call_operand.vmem [shape: f32[8,4], index: 3, kind: input, shape index: {}]   ;;  %s836_s4 = inlined_call_operand.vmem [shape: f32[8,1], index: 4, kind: input, shape index: {}]   ;;  %s837_s5 = inlined_call_operand.hbm [shape: f32[2,8,16], index: 5, kind: output, shape index: {}]  }
   0x1   :  { %12 = vsyncpa [#allocation3 + $0x1], 0  ;;  %s721_s18 = smov 0   ;;  %s723_s19 = smov 0  }
   0x2   :  { %s725_s20 = smov 0   ;;  %s727_s21 = smov 0  }
   0x3   :  { %s729_s22 = smov 0   ;;  %s731_s23 = smov 0  }
   0x4 LB: > { %s513_s24 = sadd.s32 4294967295, %s683_s23   ;;  %s514_s25 = sadd.s32 4294967294, %s683_s23   ;;  %s683_s23 = sphi %s731_s23, %s18_s23   ;;  %s679_s22 = sphi %s729_s22, %s844_s22   ;;  %s675_s21 = sphi %s727_s21, %s843_s21   ;;  %s671_s20 = sphi %s725_s20, %s842_s20   ;;  %s667_s19 = sphi %s723_s19, %s841_s19   ;;  %s663_s18 = sphi %s721_s18, %s840_s18  }
   0x5   : > { %s30_s26 = sadd.s32 1, %s679_s22  ;;  %s151_s27 = sadd.s32 1, %s671_s20 }
   0x6   : > { %p32_p0 = scmp.ge.s32.totalorder %s30_s26, 2  ;;  %p161_p1 = scmp.ne.s32.totalorder %s671_s20, %s667_s19 }
   0x7   : > { %p162_p2 = scmp.eq.s32.totalorder %s513_s24, 1  ;;  %p167_p3 = scmp.ne.s32.totalorder %s667_s19, %s663_s18 }
   0x8   : > { %s846_s26 = smov (%p32_p0, %s30_s26), 0  ;;  %p168_p5 = scmp.eq.s32.totalorder %s514_s25, 1 }
   0x9   : > { %p761_p4 = por %p162_p2, %p161_p1  ;;  %s146_s29 = ssub.s32 %s679_s22, %s846_s26 }
   0xa   : > { %p517_p6 = scmp.ge.s32.totalorder %s683_s23, 1  ;;  %p149_p7 = scmp.eq.s32.totalorder %s146_s29, 0 }
   0xb   : > { %p768_p8 = por %p168_p5, %p167_p3  ;;  %p208_p9 = scmp.lt.s32.totalorder %s683_s23, 3 }
   0xc   : > { %s774_s6 = scalar_select %p149_p7, %s671_s20, %s151_s27  }
   0xd   : > { %p209_p10 = pnand %p517_p6, %p208_p9 }
   0xe   : > { %p238_p11 = scmp.lt.s32.totalorder (!%p209_p10), %s675_s21, 1  ;;  %s688_s12 = smov (!%p209_p10), 126  }
   0xf   : > { %212 = sbr.rel (%p209_p10) target bundleno = 358 (0x166), region = 40  ;;  %s689_s13 = smov (!%p209_p10), 127  }
  0x10   : > { %s525_s9 = sshll.u32 (!%p209_p10), %s675_s21, 7  ;;  %s690_s17 = smov (!%p209_p10), [#allocation2]  }
  0x11   : > { %s440_s14 = scalar_lea.hbm (!%p209_p10), %s837_s5, %s525_s9  ;;  %s611_s24 = sshll.u32 (!%p209_p10), %s690_s17, 4  ;;  %s612_s24 = int_to_ptr.vmem [resolvable:$false] %s611_s24 }
  0x14   : > { %v685_v0 = vmov 0.0   ;;  %s239_s7 = scalar_select %p238_p11, %s675_s21, 1  ;;  %vm686_vm0 = vmmov 0   ;;  %v687_v1 = vmov 0   ;;  %v256_v4 = vld [vmem:[%s834_s2] sm:$0xff]  ;;  %vm253_vm1 = vcmask 1043456  }
  0x15   : > { %533 = vmatprep.subr.mxu0 %v685_v0  ;;  %540 = vmatprep.subr.mxu1 %v685_v0  ;;  %v340_v5 = vld [vmem:[%s836_s4] sm:$0xff]  ;;  %vm348_vm2 = vcmask 31744   ;;  %vm262_vm3 = vcmask 97280   ;;  %vm425_vm4 = vcmask 130048   ;;  %s613_s21 = scalar_lea.vmem %s612_s24, 256 }
  0x16   : > { %537 = vmatprep.mubr.msk.f32.mxu0 %vm686_vm0, %v685_v0  ;;  %542 = vmatprep.mubr.msk.f32.mxu1 %vm686_vm0, %v685_v0  ;;  %s519_s8 = sshll.u32 %s239_s7, 2  ;;  %v339_v6 = vld [vmem:[%s835_s3] sm:$0xff]  ;;  %s235_s7 = sand.u32 1, %s667_s19  }
  0x17   : > { %605 = vset.pattern.permute.xlu1 %v687_v1  ;;  %606 = vset.pattern.permute.xlu0 %v687_v1  ;;  %s244_s11 = scalar_lea.vmem %s832_s0, %s519_s8  ;;  %v255_v10 = vld [vmem:[%s833_s1] sm:$0xff]  ;;  %s518_s8 = sshll.u32 %s235_s7, 3 }
  0x18   : > { %v245_v2 = vld [vmem:[%s244_s11] sm:$0xf]  ;;  %s237_s10 = scalar_lea.vmem [#allocation2], %s518_s8  ;;  %s428_s15 = scalar_lea.sflag [#allocation3], %s235_s7 }
  0x19   : > { %251 = vrot.lane.b32.xlu0 %v245_v2, %s688_s12  ;;  %v247_v3 = vrot.slane %v245_v2, 4  ;;  %346 = vrot.lane.b32.xlu1 %v245_v2, %s689_s13  ;;  %s442_s11 = sshll.u32 %s237_s10, 4  ;;  %s443_s11 = int_to_ptr.vmem [resolvable:$true] %s442_s11 }
  0x1a   : > { %s607_s16 = scalar_lea.vmem %s443_s11, 128  ;;  %p614_p1 = scmp.lt.s32.totalorder %s443_s11, %s612_s24 }
  0x1b   : > { %p608_p12 = scmp.ne.s32.totalorder %s443_s11, %s607_s16  ;;  %p615_p2 = scmp.lt.s32.totalorder %s613_s21, %s607_s16 }
  0x1d   : > { %248 = vrot.lane.b32.xlu0 %v247_v3, %s689_s13  ;;  %259 = vperm.xlu1 %605, %v256_v4   ;;  %p609_p13 = pnand %p608_p12, %p761_p4  ;;  %p616_p3 = por %p615_p2, %p614_p1 }
  0x1f   : > { %p610_p0 = pneg %p609_p13 }
  0x21   : > { %343 = vperm.xlu0 %606, %v340_v5   ;;  %p617_p5 = pnand %p616_p3, %p610_p0 }
  0x8b   : > { %v252_v7 = vpop.permute.xlu0 %251  ;;  %v347_v8 = vpop.permute.xlu1 %346 }
  0x8c   : > { %534 = vmatpush3.msk.msra.mxu0 %vm253_vm1, %v252_v7  ;;  %541 = vmatpush3.msk.msra.mxu1 %vm253_vm1, %v347_v8 }
  0x8d   : > { %535 = vmatprep.subr.mxu0 %v685_v0  ;;  %543 = vmatmul.mubr.msk.f32.vlgmr.msra.gmra.mxu1 %vm348_vm2, %v339_v6 }
  0x8f   : > { %v249_v9 = vpop.permute.xlu0 %248 }
  0x90   : > { %v254_v11 = vsel %vm253_vm1, %v245_v2, %v249_v9 }
  0x91   : > { %536 = vmatpush3.msra.mxu0 %v254_v11 }
  0x92   : > { %538 = vmatmul.mubr.msk.f32.vlgmr.msra.gmra.mxu0 %vm262_vm3, %v255_v10 }
  0x98   : > { %v260_v14 = vpop.permute.xlu1 %259 }
  0x9c   : > { %v344_v15 = vpop.permute.xlu0 %343 }
 0x14d   : > { %v420_v12 = vpop.f32.mrf.mxu1 }
 0x14e   : > { %v421_v18 = vadd.f32 %v420_v12, %v344_v15 }
 0x14f   : > { %v544_v13 = vpop.f32.mrf.mxu1 }
 0x152   : > { %v334_v16 = vpop.f32.mrf.mxu0 }
 0x153   : > { %v335_v17 = vadd.f32 %v334_v16, %v260_v14 }
 0x154   : > { %v539_v19 = vpop.f32.mrf.mxu0 }
 0x155   : > { %v338_v20 = vmax.f32 %v335_v17, 0.0 }
 0x157   : > { %v424_v21 = vadd.f32 %v421_v18, %v338_v20 }
 0x159   : > { %426 = vst.msk [vmem:[%s237_s10] sm:$0xff] %vm425_vm4, %v424_v21 }
 0x15a   : > { %620 = shalt.err (!%p617_p5)
}
 0x15b   : > { %s621_s25 = scalar_lea.hbm %s440_s14, 128  ;;  %s625_s7 = scalar_lea.hbm %s837_s5, 256 }
 0x15c   : > { %p622_p6 = scmp.ne.s32.totalorder %s440_s14, %s621_s25  ;;  %p626_p10 = scmp.lt.s32.totalorder %s440_s14, %s837_s5 }
 0x15d   : > { %p627_p11 = scmp.lt.s32.totalorder %s625_s7, %s621_s25 }
 0x15e   : > { %p623_p7 = pnand %p622_p6, %p761_p4 }
 0x15f   : > { %p628_p12 = por %p627_p11, %p626_p10 }
 0x160   : > { %p624_p9 = pneg %p623_p7 }
 0x162   : > { %p629_p13 = pnand %p628_p12, %p624_p9 }
 0x164   : > { %632 = shalt.err (!%p629_p13)
}
 0x165   : > { %545 = dma.vmem_to_hbm [thread:$0]  (%p761_p4), %s443_s11, 128, %s440_s14, %s428_s15  }
 0x166 PF: > { %p551_p0 = scmp.ge.s32.totalorder %s683_s23, 2  ;;  %s454_s10 = sand.u32 1, %s663_s18  }
 0x167   : > { %s455_s12 = scalar_lea.sflag [#allocation3], %s454_s10 }
 0x168   : > { %p548_p1 = pnand %p551_p0, %p768_p8 }
 0x16a   : > { %p549_p2 = pneg %p548_p1 }
 0x16c   : > { %658 = dma.done.wait (%p549_p2), %s455_s12, 128  }
 0x16d   : > { %660 = vsyncadd (%p549_p2), %s455_s12, 4294967168  ;;  %s18_s23 = sadd.s32 1, %s683_s23   ;;  %s840_s18 = smov %s667_s19 }
 0x16e   : > { %p15_p3 = scmp.ge.s32.totalorder %s18_s23, 4   ;;  %s841_s19 = smov %s671_s20 }
 0x16f   : > { %s842_s20 = smov %s774_s6  ;;  %s843_s21 = smov %s679_s22 }
 0x170   : > { %s844_s22 = smov %s846_s26  ;;  %17 = sbr.rel (!%p15_p3) target bundleno = 4 (0x4), region = 75 }
 0x175   :  { %460 = vsyncpa [#allocation3], 1 }
 0x176   :  { %462 = vsyncpa [#allocation3 + $0x1], 1 }

</bundles_post_ra>
